<compile_context>
chip_gen: v7x
topology: tpu7x:2x2x1
jax: 0.10.0
libtpu: 0.0.40
codegen_flags: <defaults>
</compile_context>

<pallas_src>
import jax
import jax.numpy as jnp
from jax.experimental import pallas as pl
from jax.experimental.pallas import tpu as pltpu

LANE = 128      # vreg lane width
SUBLANE = 8     # vreg sublane count


def _round_up(v, m):
    return ((v + m - 1) // m) * m


def _pad2d(a, rows, cols):
    r, c = a.shape
    if r == rows and c == cols:
        return a
    return jnp.pad(a, ((0, rows - r), (0, cols - c)))


def _vmem_budget():
    """(physical VMEM bytes per core, usable budget) -- generation aware."""
    cap = None
    try:
        cap = getattr(pltpu.get_tpu_info(), "vmem_capacity_bytes", None)
    except Exception:
        cap = None
    if not cap:
        cap = 64 * 2**20            # conservative fallback: v7x has 64 MiB / TC
    cap = int(cap)
    # ~65% of physical: ~83 MiB on v5e/v6e (128 MiB), ~42 MiB on v7x (64 MiB).
    return cap, int(cap * 0.65)


def _pick_tile(dim, t_max, unit, other_steps=1):
    """Largest tile (multiple of `unit`, <= t_max) along `dim`.

    Prefers (a) exact divisors of `dim` (no HBM padding, no ragged block) and
    (b) an even total grid-step count so v7x megacore load-balances its two
    TensorCores. Falls back to a ragged (Pallas-clipped) last block when the
    divisor structure is hostile.
    """
    t_max = max(unit, (t_max // unit) * unit)
    if dim <= t_max:
        if other_steps % 2 == 1 and dim % (2 * unit) == 0:
            return dim // 2                      # two even steps for megacore
        return dim                               # single full-dim block (always legal)
    best_even = best_any = None
    for d in range(unit, t_max + 1, unit):
        if dim % d == 0:
            best_any = d
            if (other_steps * (dim // d)) % 2 == 0:
                best_even = d
    pick = best_even if best_even is not None else best_any
    if pick is not None and pick * 4 >= t_max:
        return pick
    # Only tiny exact divisors (or none): take the big tile and let Pallas clip
    # the boundary block (garbage rows only affect their own, discarded output).
    return t_max


# ---------------------------------------------------------------------------
# Kernel bodies
# ---------------------------------------------------------------------------
def _attention_kernel_rows(g_ref, x_ref, wg_ref, wx_ref, shift_ref, wpsi_ref,
                           pshift_ref, out_ref):
    """Pixels-on-sublane / channels-on-lane layout (NHWC path).

    g_ref: (TP, F_g), x_ref: (TP, F_l)           (native dtype)
    wg_ref: (F_g, F_int_p), wx_ref: (F_l, F_int_p)  (BN scale folded, native dtype)
    shift_ref/wpsi_ref: (1, F_int_p) f32 ; pshift_ref: (1,1) f32 in SMEM
    """
    g = g_ref[...]
    x = x_ref[...]
    # 1x1 convs == per-pixel matmuls on the MXU; f32 accumulation.
    g1 = jnp.dot(g, wg_ref[...], preferred_element_type=jnp.float32)
    x1 = jnp.dot(x, wx_ref[...], preferred_element_type=jnp.float32)
    p = jnp.maximum(g1 + x1 + shift_ref[...], 0.0)            # (TP, F_int_p) f32
    # psi conv has 1 output channel: VPU multiply + lane (XLU) reduction.
    psi = jnp.sum(p * wpsi_ref[...], axis=-1, keepdims=True) + pshift_ref[0, 0]
    psi = jax.nn.sigmoid(psi)                                  # (TP, 1) f32
    # Gate in the activation dtype (no f32 upcast of x).
    out_ref[...] = (x * psi.astype(x.dtype)).astype(out_ref.dtype)


def _attention_kernel_cols(g_ref, x_ref, wgt_ref, wxt_ref, shift_ref, wpsi_ref,
                           pshift_ref, out_ref):
    """Channels-on-sublane / pixels-on-lane layout (native NCHW path).

    g_ref: (F_g, THW), x_ref: (F_l, THW)          (native dtype)
    wgt_ref: (F_int_p, F_g), wxt_ref: (F_int_p, F_l) (native dtype)
    shift_ref/wpsi_ref: (F_int_p, 1) f32 ; pshift_ref: (1,1) f32 in SMEM
    """
    g = g_ref[...]
    x = x_ref[...]
    g1 = jnp.dot(wgt_ref[...], g, preferred_element_type=jnp.float32)   # (F_int_p, THW)
    x1 = jnp.dot(wxt_ref[...], x, preferred_element_type=jnp.float32)
    p = jnp.maximum(g1 + x1 + shift_ref[...], 0.0)
    # 1-output-channel psi conv: VPU multiply + sublane (XLU) reduction.
    psi = jnp.sum(p * wpsi_ref[...], axis=0, keepdims=True) + pshift_ref[0, 0]
    psi = jax.nn.sigmoid(psi)                                  # (1, THW) f32
    out_ref[...] = (x * psi.astype(x.dtype)).astype(out_ref.dtype)


# ---------------------------------------------------------------------------
# Pixels x channels wrapper (NHWC / flat layout)
# ---------------------------------------------------------------------------
def attention_block_pallas(g_flat, x_flat, params, *, tile_p=None):
    """g_flat: (P, F_g), x_flat: (P, F_l) -> (P, F_l)."""
    P, F_g = g_flat.shape
    Px, F_l = x_flat.shape
    assert P == Px
    F_int = params["wg"].shape[1]
    dt = x_flat.dtype
    itemsize = jnp.dtype(dt).itemsize
    F_int_p = _round_up(F_int, LANE)       # lane-dense intermediates (weights only)

    wg = _pad2d(params["wg"], F_g, F_int_p).astype(dt)
    wx = _pad2d(params["wx"], F_l, F_int_p).astype(dt)
    shift = _pad2d(params["shift"], 1, F_int_p).astype(jnp.float32)
    wpsi = _pad2d(params["wpsi"], 1, F_int_p).astype(jnp.float32)
    pshift = params["pshift"].astype(jnp.float32).reshape(1, 1)

    weight_bytes = (F_g + F_l) * F_int_p * itemsize + 2 * F_int_p * 4

    cap, budget = _vmem_budget()
    # Per-pixel bytes: 2x-buffered g/x/out streams + single-buffered f32
    # intermediates (g1, x1, p) + gated product in the activation dtype.
    per_px = 2 * (F_g + 2 * F_l) * itemsize + 3 * F_int_p * 4 + F_l * itemsize
    if tile_p is None:
        avail = max(budget - weight_bytes - (2 << 20), 1 << 20)
        t_max = min(max(avail // per_px, SUBLANE), 8192)
        tile_p = _pick_tile(P, int(t_max), SUBLANE)
    working = tile_p * per_px + weight_bytes + (2 << 20)
    vmem_limit = int(min(cap * 0.85, max(working + (12 << 20), 32 << 20)))

    grid = (pl.cdiv(P, tile_p),)
    cost = pl.CostEstimate(
        flops=int(2 * P * F_int_p * (F_g + F_l) + 5 * P * F_int_p),
        transcendentals=int(P),
        bytes_accessed=int(P * (F_g + 2 * F_l) * itemsize + weight_bytes),
    )

    def const(shape):
        # Constant-index blocks: single-buffered, DMA elided after step 0.
        return pl.BlockSpec(shape, lambda i: (0, 0), pipeline_mode=pl.Buffered(1))

    return pl.pallas_call(
        _attention_kernel_rows,
        out_shape=jax.ShapeDtypeStruct((P, F_l), dt),
        grid_spec=pltpu.PrefetchScalarGridSpec(
            num_scalar_prefetch=0,
            grid=grid,
            in_specs=[
                pl.BlockSpec((tile_p, F_g), lambda i: (i, 0)),     # g tile
                pl.BlockSpec((tile_p, F_l), lambda i: (i, 0)),     # x tile
                const((F_g, F_int_p)),                             # Wg'
                const((F_l, F_int_p)),                             # Wx'
                const((1, F_int_p)),                               # merged shift
                const((1, F_int_p)),                               # Wpsi'
                pl.BlockSpec(memory_space=pltpu.MemorySpace.SMEM), # psi shift
            ],
            out_specs=pl.BlockSpec((tile_p, F_l), lambda i: (i, 0)),
        ),
        compiler_params=pltpu.CompilerParams(
            dimension_semantics=("parallel",),
            vmem_limit_bytes=vmem_limit,
        ),
        cost_estimate=cost,
    )(g_flat, x_flat, wg, wx, shift, wpsi, pshift)


def attention_block_nhwc(g_nhwc, x_nhwc, params, *, tile_p=None):
    """NHWC entry point (preferred for JAX-native/NHWC pipelines)."""
    N, H, W, Cg = g_nhwc.shape
    Cl = x_nhwc.shape[-1]
    out = attention_block_pallas(g_nhwc.reshape(N * H * W, Cg),
                                 x_nhwc.reshape(N * H * W, Cl),
                                 params, tile_p=tile_p)
    return out.reshape(N, H, W, Cl)


# ---------------------------------------------------------------------------
# NCHW-native wrapper (PyTorch layout, zero HBM transposes / pads)
# ---------------------------------------------------------------------------
def attention_block_nchw(g_nchw, x_nchw, params, *, tile_hw=None):
    """Consumes NCHW directly: channels on sublanes, pixels on lanes."""
    N, F_g, H, W = g_nchw.shape
    F_l = x_nchw.shape[1]
    HW = H * W
    F_int = params["wg"].shape[1]
    dt = x_nchw.dtype
    itemsize = jnp.dtype(dt).itemsize
    F_int_p = _round_up(F_int, SUBLANE)    # F_int sits on sublanes in this layout

    wgt = _pad2d(params["wg"].T, F_int_p, F_g).astype(dt)          # (F_int_p, F_g)
    wxt = _pad2d(params["wx"].T, F_int_p, F_l).astype(dt)          # (F_int_p, F_l)
    shift = _pad2d(params["shift"].T, F_int_p, 1).astype(jnp.float32)
    wpsi = _pad2d(params["wpsi"].T, F_int_p, 1).astype(jnp.float32)
    pshift = params["pshift"].astype(jnp.float32).reshape(1, 1)

    g3 = g_nchw.reshape(N, F_g, HW)        # contiguous views, no HBM copies
    x3 = x_nchw.reshape(N, F_l, HW)

    weight_bytes = (F_g + F_l) * F_int_p * itemsize + 2 * F_int_p * 4

    cap, budget = _vmem_budget()
    per_col = 2 * (F_g + 2 * F_l) * itemsize + 3 * F_int_p * 4 + F_l * itemsize
    if tile_hw is None:
        avail = max(budget - weight_bytes - (2 << 20), 1 << 20)
        t_max = min(max(avail // per_col, LANE), 32768)
        tile_hw = _pick_tile(HW, int(t_max), LANE, other_steps=N)
    working = tile_hw * per_col + weight_bytes + (2 << 20)
    vmem_limit = int(min(cap * 0.85, max(working + (12 << 20), 32 << 20)))

    grid = (N, pl.cdiv(HW, tile_hw))
    P = N * HW
    cost = pl.CostEstimate(
        flops=int(2 * P * F_int_p * (F_g + F_l) + 5 * P * F_int_p),
        transcendentals=int(P),
        bytes_accessed=int(P * (F_g + 2 * F_l) * itemsize + weight_bytes),
    )

    def const(shape):
        return pl.BlockSpec(shape, lambda n, j: (0, 0), pipeline_mode=pl.Buffered(1))

    out = pl.pallas_call(
        _attention_kernel_cols,
        out_shape=jax.ShapeDtypeStruct((N, F_l, HW), dt),
        grid_spec=pltpu.PrefetchScalarGridSpec(
            num_scalar_prefetch=0,
            grid=grid,
            in_specs=[
                pl.BlockSpec((None, F_g, tile_hw), lambda n, j: (n, 0, j)),  # g tile
                pl.BlockSpec((None, F_l, tile_hw), lambda n, j: (n, 0, j)),  # x tile
                const((F_int_p, F_g)),                                       # Wg'^T
                const((F_int_p, F_l)),                                       # Wx'^T
                const((F_int_p, 1)),                                         # merged shift
                const((F_int_p, 1)),                                         # Wpsi'^T
                pl.BlockSpec(memory_space=pltpu.MemorySpace.SMEM),           # psi shift
            ],
            out_specs=pl.BlockSpec((None, F_l, tile_hw), lambda n, j: (n, 0, j)),
        ),
        compiler_params=pltpu.CompilerParams(
            dimension_semantics=("parallel", "parallel"),
            vmem_limit_bytes=vmem_limit,
        ),
        cost_estimate=cost,
    )(g3, x3, wgt, wxt, shift, wpsi, pshift)
    return out.reshape(N, F_l, H, W)


# ---------------------------------------------------------------------------
# Parameters: raw (PyTorch-like) + fold (conv bias + eval BN -> weights/shift)
# ---------------------------------------------------------------------------
def make_raw_params(key, F_g, F_l, F_int):
    ks = jax.random.split(key, 18)   # all-distinct keys

    def conv_w(k, cout, cin):
        return 0.1 * jax.random.normal(k, (cout, cin), jnp.float32)

    def bias(k, c):
        return 0.1 * jax.random.normal(k, (c,), jnp.float32)

    def bn(k0, k1, k2, k3, c):
        gamma = 1.0 + 0.1 * jax.random.normal(k0, (c,), jnp.float32)
        beta = 0.1 * jax.random.normal(k1, (c,), jnp.float32)
        mean = 0.1 * jax.random.normal(k2, (c,), jnp.float32)
        var = jnp.abs(jax.random.normal(k3, (c,), jnp.float32)) + 0.5
        return gamma, beta, mean, var

    return {
        "Wg": conv_w(ks[0], F_int, F_g), "bg": bias(ks[1], F_int),
        "bn_g": bn(ks[2], ks[3], ks[4], ks[5], F_int),
        "Wx": conv_w(ks[6], F_int, F_l), "bx": bias(ks[7], F_int),
        "bn_x": bn(ks[8], ks[9], ks[10], ks[11], F_int),
        "Wp": conv_w(ks[12], 1, F_int), "bp": bias(ks[13], 1),
        "bn_p": bn(ks[14], ks[15], ks[16], ks[17], 1),
    }


def fold_params(raw, eps=1e-5):
    """Fold conv bias + eval-mode BN: scale into weight columns, shift additive."""
    def fold(W, b, bn):                      # W: (Cout, Cin)
        gamma, beta, mean, var = bn
        scale = gamma / jnp.sqrt(var + eps)                  # (Cout,)
        shift = beta + scale * (b - mean)                    # (Cout,)
        return W.T * scale[None, :], shift                   # (Cin, Cout)

    wg, gshift = fold(raw["Wg"], raw["bg"], raw["bn_g"])
    wx, xshift = fold(raw["Wx"], raw["bx"], raw["bn_x"])
    wp, pshift = fold(raw["Wp"], raw["bp"], raw["bn_p"])     # wp: (F_int, 1)
    return {
        "wg": wg,                                  # (F_g, F_int)
        "wx": wx,                                  # (F_l, F_int)
        "shift": (gshift + xshift)[None, :],       # (1, F_int)
        "wpsi": wp.T,                              # (1, F_int)
        "pshift": pshift.reshape(1, 1),            # (1, 1)
    }
    # TODO(synk): training-mode BatchNorm (batch statistics) is not folded here.


# ---------------------------------------------------------------------------
# Pure-JAX reference with the exact PyTorch (eval-mode) math, NCHW.
# ---------------------------------------------------------------------------
def reference_nchw(g, x, raw, eps=1e-5):
    def conv1x1(y, W, b):                    # y: (N,C,H,W), W: (Cout,Cin)
        return jnp.einsum("nchw,oc->nohw", y, W) + b[None, :, None, None]

    def batchnorm(y, bn):
        gamma, beta, mean, var = bn
        inv = gamma / jnp.sqrt(var + eps)
        return (y * inv[None, :, None, None]
                + (beta - mean * inv)[None, :, None, None])

    g1 = batchnorm(conv1x1(g, raw["Wg"], raw["bg"]), raw["bn_g"])
    x1 = batchnorm(conv1x1(x, raw["Wx"], raw["bx"]), raw["bn_x"])
    p = jnp.maximum(g1 + x1, 0.0)
    psi = jax.nn.sigmoid(batchnorm(conv1x1(p, raw["Wp"], raw["bp"]), raw["bn_p"]))
    return x * psi


if __name__ == "__main__":
    # Small shapes consistent with the module's forward: NCHW inputs.
    N, F_g, F_l, F_int, H, W = 2, 4, 4, 8, 16, 16

    key = jax.random.PRNGKey(0)
    kg, kx, kp = jax.random.split(key, 3)
    g = jax.random.normal(kg, (N, F_g, H, W), jnp.float32)
    x = jax.random.normal(kx, (N, F_l, H, W), jnp.float32)

    raw = make_raw_params(kp, F_g, F_l, F_int)
    params = fold_params(raw)
    ref = reference_nchw(g, x, raw)

    # NCHW-native kernel (PyTorch layout, no HBM transposes).
    out_nchw = jax.block_until_ready(attention_block_nchw(g, x, params))
    assert out_nchw.shape == (N, F_l, H, W)
    err = float(jnp.max(jnp.abs(out_nchw - ref)))
    assert jnp.allclose(out_nchw, ref, atol=1e-4, rtol=1e-4), f"nchw mismatch {err}"

    # NHWC (pixels x channels) kernel path.
    g_nhwc = jnp.transpose(g, (0, 2, 3, 1))
    x_nhwc = jnp.transpose(x, (0, 2, 3, 1))
    out_nhwc = jax.block_until_ready(attention_block_nhwc(g_nhwc, x_nhwc, params))
    ref_nhwc = jnp.transpose(ref, (0, 2, 3, 1))
    err2 = float(jnp.max(jnp.abs(out_nhwc - ref_nhwc)))
    assert jnp.allclose(out_nhwc, ref_nhwc, atol=1e-4, rtol=1e-4), f"nhwc mismatch {err2}"

    print("KERNEL_OK")
</pallas_src>

<mosaic_0001>
module attributes {stable_mosaic.version = 11 : i64} {
  func.func @_attention_kernel_cols(%arg0: i32, %arg1: i32, %arg2: memref<1x4x256xf32, #tpu.memory_space<vmem>>, %arg3: memref<1x4x256xf32, #tpu.memory_space<vmem>>, %arg4: memref<8x4xf32, #tpu.memory_space<vmem>>, %arg5: memref<8x4xf32, #tpu.memory_space<vmem>>, %arg6: memref<8x1xf32, #tpu.memory_space<vmem>>, %arg7: memref<8x1xf32, #tpu.memory_space<vmem>>, %arg8: memref<1x1xf32, #tpu.memory_space<smem>>, %arg9: memref<1x4x256xf32, #tpu.memory_space<vmem>>) attributes {dimension_semantics = [#tpu.dimension_semantics<parallel>, #tpu.dimension_semantics<parallel>], iteration_bounds = array<i64: 2, 1>, scalar_prefetch = 0 : i64, scratch_operands = 0 : i64, tpu.core_type = #tpu.core_type<tc>, window_params = [{transform_indices = @transform_0, window_bounds = array<i64: 1, 4, 256>}, {transform_indices = @transform_1, window_bounds = array<i64: 1, 4, 256>}, {pipeline_mode = #tpu.pipeline_mode<synchronous>, transform_indices = @transform_2, window_bounds = array<i64: 8, 4>}, {pipeline_mode = #tpu.pipeline_mode<synchronous>, transform_indices = @transform_3, window_bounds = array<i64: 8, 4>}, {pipeline_mode = #tpu.pipeline_mode<synchronous>, transform_indices = @transform_4, window_bounds = array<i64: 8, 1>}, {pipeline_mode = #tpu.pipeline_mode<synchronous>, transform_indices = @transform_5, window_bounds = array<i64: 8, 1>}, {transform_indices = @transform_6, window_bounds = array<i64: 1, 1>}, {transform_indices = @transform_7, window_bounds = array<i64: 1, 4, 256>}]} {
    %c0 = arith.constant 0 : index
    %c0_0 = arith.constant 0 : index
    %c0_1 = arith.constant 0 : index
    %0 = vector.load %arg2[%c0, %c0_0, %c0_1] : memref<1x4x256xf32, #tpu.memory_space<vmem>>, vector<1x4x256xf32>
    %1 = vector.shape_cast %0 : vector<1x4x256xf32> to vector<4x256xf32>
    %c0_2 = arith.constant 0 : index
    %c0_3 = arith.constant 0 : index
    %c0_4 = arith.constant 0 : index
    %2 = vector.load %arg3[%c0_2, %c0_3, %c0_4] : memref<1x4x256xf32, #tpu.memory_space<vmem>>, vector<1x4x256xf32>
    %3 = vector.shape_cast %2 : vector<1x4x256xf32> to vector<4x256xf32>
    %c0_5 = arith.constant 0 : index
    %c0_6 = arith.constant 0 : index
    %4 = vector.load %arg4[%c0_5, %c0_6] : memref<8x4xf32, #tpu.memory_space<vmem>>, vector<8x4xf32>
    %cst = arith.constant dense<0.000000e+00> : vector<8x256xf32>
    %5 = tpu.matmul %4, %1, %cst {dimension_numbers = #tpu.dot_dimension_numbers<[1], [0], [0], [1], [0, 0, 1, 1], [], []>} : vector<8x4xf32>, vector<4x256xf32>, vector<8x256xf32> -> vector<8x256xf32>
    %c0_7 = arith.constant 0 : index
    %c0_8 = arith.constant 0 : index
    %6 = vector.load %arg5[%c0_7, %c0_8] : memref<8x4xf32, #tpu.memory_space<vmem>>, vector<8x4xf32>
    %cst_9 = arith.constant dense<0.000000e+00> : vector<8x256xf32>
    %7 = tpu.matmul %6, %3, %cst_9 {dimension_numbers = #tpu.dot_dimension_numbers<[1], [0], [0], [1], [0, 0, 1, 1], [], []>} : vector<8x4xf32>, vector<4x256xf32>, vector<8x256xf32> -> vector<8x256xf32>
    %8 = arith.addf %5, %7 : vector<8x256xf32>
    %c0_10 = arith.constant 0 : index
    %c0_11 = arith.constant 0 : index
    %9 = vector.load %arg6[%c0_10, %c0_11] : memref<8x1xf32, #tpu.memory_space<vmem>>, vector<8x1xf32>
    %10 = vector.broadcast %9 : vector<8x1xf32> to vector<8x256xf32>
    %11 = arith.addf %8, %10 : vector<8x256xf32>
    %cst_12 = arith.constant 0.000000e+00 : f32
    %12 = vector.broadcast %cst_12 : f32 to vector<8x256xf32>
    %13 = arith.maximumf %11, %12 : vector<8x256xf32>
    %c0_13 = arith.constant 0 : index
    %c0_14 = arith.constant 0 : index
    %14 = vector.load %arg7[%c0_13, %c0_14] : memref<8x1xf32, #tpu.memory_space<vmem>>, vector<8x1xf32>
    %15 = vector.broadcast %14 : vector<8x1xf32> to vector<8x256xf32>
    %16 = arith.mulf %13, %15 : vector<8x256xf32>
    %cst_15 = arith.constant dense<0.000000e+00> : vector<256xf32>
    %17 = vector.multi_reduction <add>, %16, %cst_15 [0] : vector<8x256xf32> to vector<256xf32>
    %18 = vector.shape_cast %17 : vector<256xf32> to vector<1x256xf32>
    %c0_16 = arith.constant 0 : index
    %c0_17 = arith.constant 0 : index
    %19 = memref.load %arg8[%c0_16, %c0_17] : memref<1x1xf32, #tpu.memory_space<smem>>
    %20 = vector.broadcast %19 : f32 to vector<1x256xf32>
    %21 = arith.addf %18, %20 : vector<1x256xf32>
    %22 = arith.negf %21 : vector<1x256xf32>
    %23 = math.exp %22 : vector<1x256xf32>
    %cst_18 = arith.constant 1.000000e+00 : f32
    %24 = vector.broadcast %cst_18 : f32 to vector<1x256xf32>
    %25 = arith.addf %24, %23 : vector<1x256xf32>
    %26 = arith.divf %24, %25 : vector<1x256xf32>
    %27 = vector.broadcast %26 : vector<1x256xf32> to vector<4x256xf32>
    %28 = arith.mulf %3, %27 : vector<4x256xf32>
    %c0_19 = arith.constant 0 : index
    %c0_20 = arith.constant 0 : index
    %c0_21 = arith.constant 0 : index
    %29 = vector.load %arg9[%c0_19, %c0_20, %c0_21] : memref<1x4x256xf32, #tpu.memory_space<vmem>>, vector<1x4x256xf32>
    %30 = vector.shape_cast %29 : vector<1x4x256xf32> to vector<4x256xf32>
    %31 = vector.shape_cast %28 : vector<4x256xf32> to vector<1x4x256xf32>
    tpu.vector_store %arg9[%c0_19, %c0_20, %c0_21], %31 {strides = array<i32>} : memref<1x4x256xf32, #tpu.memory_space<vmem>>, vector<1x4x256xf32>,
    return
  }
  func.func @transform_0(%arg0: i32, %arg1: i32) -> (i32, i32, i32) {
    %c0_i32 = arith.constant 0 : i32
    %c0_i32_0 = arith.constant 0 : i32
    return %arg0, %c0_i32, %arg1 : i32, i32, i32
  }
  func.func @transform_1(%arg0: i32, %arg1: i32) -> (i32, i32, i32) {
    %c0_i32 = arith.constant 0 : i32
    %c0_i32_0 = arith.constant 0 : i32
    return %arg0, %c0_i32, %arg1 : i32, i32, i32
  }
  func.func @transform_2(%arg0: i32, %arg1: i32) -> (i32, i32) {
    %c0_i32 = arith.constant 0 : i32
    %c0_i32_0 = arith.constant 0 : i32
    %c0_i32_1 = arith.constant 0 : i32
    return %c0_i32, %c0_i32_0 : i32, i32
  }
  func.func @transform_3(%arg0: i32, %arg1: i32) -> (i32, i32) {
    %c0_i32 = arith.constant 0 : i32
    %c0_i32_0 = arith.constant 0 : i32
    %c0_i32_1 = arith.constant 0 : i32
    return %c0_i32, %c0_i32_0 : i32, i32
  }
  func.func @transform_4(%arg0: i32, %arg1: i32) -> (i32, i32) {
    %c0_i32 = arith.constant 0 : i32
    %c0_i32_0 = arith.constant 0 : i32
    %c0_i32_1 = arith.constant 0 : i32
    return %c0_i32, %c0_i32_0 : i32, i32
  }
  func.func @transform_5(%arg0: i32, %arg1: i32) -> (i32, i32) {
    %c0_i32 = arith.constant 0 : i32
    %c0_i32_0 = arith.constant 0 : i32
    %c0_i32_1 = arith.constant 0 : i32
    return %c0_i32, %c0_i32_0 : i32, i32
  }
  func.func @transform_6(%arg0: i32, %arg1: i32) -> (i32, i32) {
    %c0_i32 = arith.constant 0 : i32
    %c0_i32_0 = arith.constant 0 : i32
    %c0_i32_1 = arith.constant 0 : i32
    return %c0_i32, %c0_i32_0 : i32, i32
  }
  func.func @transform_7(%arg0: i32, %arg1: i32) -> (i32, i32, i32) {
    %c0_i32 = arith.constant 0 : i32
    %c0_i32_0 = arith.constant 0 : i32
    return %arg0, %c0_i32, %arg1 : i32, i32, i32
  }
}

</mosaic_0001>

<bundles_post_ra>
// kernel: tpu_custom_call.1
= control target key start
LH: loop header
LB: loop body
LE: loop exit
PB: predicated region body
PF: predicated region fallthrough
CT: control target
= control target key end

     0   :  { %s1029_s0 = inlined_call_operand.vmem [shape: f32[2,4,256], index: 0, kind: input, shape index: {}]   ;;  %s1030_s1 = inlined_call_operand.vmem [shape: f32[2,4,256], index: 1, kind: input, shape index: {}]   ;;  %s1031_s2 = inlined_call_operand.vmem [shape: f32[8,4], index: 2, kind: input, shape index: {}]   ;;  %s1032_s3 = inlined_call_operand.vmem [shape: f32[8,4], index: 3, kind: input, shape index: {}]   ;;  %s1033_s4 = inlined_call_operand.vmem [shape: f32[8,1], index: 4, kind: input, shape index: {}]   ;;  %s1034_s5 = inlined_call_operand.vmem [shape: f32[8,1], index: 5, kind: input, shape index: {}]   ;;  %s1035_s6 = inlined_call_operand.<no memory space> [shape: f32[1,1], index: 6, kind: input, shape index: {}]   ;;  %s1036_s7 = inlined_call_operand.hbm [shape: f32[2,4,256], index: 7, kind: output, shape index: {}]  }
   0x1   :  { %12 = sst [smem:[#allocation2]] %s1035_s6 }
   0x2   :  { %13 = vsyncpa [#allocation4], 0 }
   0x3   :  { %15 = vsyncpa [#allocation4 + $0x1], 0  ;;  %s896_s26 = smov 0   ;;  %s898_s27 = smov 0  }
   0x4   :  { %s900_s28 = smov 0   ;;  %s902_s29 = smov 0  }
   0x5   :  { %s904_s30 = smov 0   ;;  %s906_s8 = smov 0  }
   0x6 LB: > { %s674_s6 = sadd.s32 4294967295, %s848_s8   ;;  %s675_s9 = sadd.s32 4294967294, %s848_s8   ;;  %s848_s8 = sphi %s906_s8, %s21_s8   ;;  %s844_s30 = sphi %s904_s30, %s1043_s30   ;;  %s840_s29 = sphi %s902_s29, %s1042_s29   ;;  %s836_s28 = sphi %s900_s28, %s1041_s28   ;;  %s832_s27 = sphi %s898_s27, %s1040_s27   ;;  %s828_s26 = sphi %s896_s26, %s1039_s26  }
   0x7   : > { %s33_s10 = sadd.s32 1, %s844_s30  ;;  %s203_s11 = sadd.s32 1, %s836_s28 }
   0x8   : > { %p35_p0 = scmp.ge.s32.totalorder %s33_s10, 2  ;;  %p213_p1 = scmp.ne.s32.totalorder %s836_s28, %s832_s27 }
   0x9   : > { %p214_p2 = scmp.eq.s32.totalorder %s674_s6, 1  ;;  %p219_p3 = scmp.ne.s32.totalorder %s832_s27, %s828_s26 }
   0xa   : > { %s1045_s10 = smov (%p35_p0, %s33_s10), 0  ;;  %p220_p5 = scmp.eq.s32.totalorder %s675_s9, 1 }
   0xb   : > { %p936_p4 = por %p214_p2, %p213_p1  ;;  %s198_s13 = ssub.s32 %s844_s30, %s1045_s10 }
   0xc   : > { %p678_p6 = scmp.ge.s32.totalorder %s848_s8, 1  ;;  %p201_p7 = scmp.eq.s32.totalorder %s198_s13, 0 }
   0xd   : > { %p943_p8 = por %p220_p5, %p219_p3  ;;  %p279_p9 = scmp.lt.s32.totalorder %s848_s8, 3 }
   0xe   : > { %s949_s15 = scalar_select %p201_p7, %s836_s28, %s203_s11  }
   0xf   : > { %p280_p10 = pnand %p678_p6, %p279_p9 }
  0x10   : > { %p325_p11 = scmp.lt.s32.totalorder (!%p280_p10), %s840_s29, 1  ;;  %v850_v0 = vmov (!%p280_p10), 0.0   ;;  %v511_v1 = vld [vmem:[%s1033_s4] sm:$0xff] (!%p280_p10)  ;;  %v851_v2 = vmov (!%p280_p10), 0   ;;  %vm355_vm0 = vcmask (!%p280_p10), 1043456   ;;  %vm351_vm1 = vcmask (!%p280_p10), 31744  }
  0x11   : > { %283 = sbr.rel (%p280_p10) target bundleno = 313 (0x139), region = 48  ;;  %424 = vmatprep.mubr.f32.mxu1 (!%p280_p10), %v850_v0  ;;  %504 = vmatprep.mubr.f32.mxu0 (!%p280_p10), %v850_v0  ;;  %v521_v3 = vld [vmem:[%s1034_s5] sm:$0xff] (!%p280_p10)  ;;  %s699_s21 = sshll.u32 (!%p280_p10), %s840_s29, 7 }
  0x12   : > { %759 = vset.pattern.permute.xlu0 (!%p280_p10), %v851_v2  ;;  %v348_v8 = vld [vmem:[%s1032_s3] sm:$0xff] (!%p280_p10)  ;;  %s982_s6 = scalar_lea.hbm (!%p280_p10), %s1036_s7, %s699_s21 }
  0x13   : > { %514 = vperm.xlu0 (!%p280_p10), %759, %v511_v1   ;;  %v347_v9 = vld [vmem:[%s1031_s2] sm:$0xff] (!%p280_p10) }
  0x17   : > { %524 = vperm.xlu0 (!%p280_p10), %759, %v521_v3  }
  0x18   : > { %s326_s18 = scalar_select %p325_p11, %s840_s29, 1 }
  0x19   : > { %s852_s29 = smov [#allocation3]  }
  0x1a   : > { %s697_s19 = sshll.u32 %s326_s18, 3  ;;  %s541_s18 = sld [smem:[#allocation2]] }
  0x1b   : > { %s342_s24 = scalar_lea.vmem %s1030_s1, %s697_s19  ;;  %s332_s9 = scalar_lea.vmem %s1029_s0, %s697_s19 }
  0x1c   : > { %v965_v4 = vld [vmem:[%s342_s24] sm:$0xff]  ;;  %s321_s19 = sand.u32 1, %s832_s27   ;;  %s774_s13 = sshll.u32 %s852_s29, 4  ;;  %s775_s13 = int_to_ptr.vmem [resolvable:$false] %s774_s13 }
  0x1d   : > { %v345_v5 = vld [vmem:[%s332_s9] sm:$0xff]  ;;  %v350_v6 = vcombine.high %v965_v4, %v965_v4  ;;  %s679_s20 = sshll.u32 %s321_s19, 3  ;;  %s564_s9 = scalar_lea.sflag [#allocation4], %s321_s19 }
  0x1e   : > { %v432_v7 = vcombine.high %v345_v5, %v345_v5  ;;  %s323_s22 = scalar_lea.vmem [#allocation3], %s679_s20  ;;  %s776_s16 = scalar_lea.vmem %s775_s13, 256 }
  0x1f   : > { %684 = vmatprep.subr.msk.mxu1 %vm355_vm0, %v350_v6  ;;  %s580_s23 = sshll.u32 %s323_s22, 4  ;;  %s984_s23 = int_to_ptr.vmem [resolvable:$true] %s580_s23 }
  0x20   : > { %687 = vmatprep.subr.msk.mxu0 %vm355_vm0, %v432_v7  ;;  %685 = vmatpush1.msk.msra.mxu1 %vm355_vm0, %v965_v4  ;;  %v542_v33 = vstv %s541_s18  ;;  %s770_s11 = scalar_lea.vmem %s984_s23, 128  ;;  %p777_p1 = scmp.lt.s32.totalorder %s984_s23, %s775_s13 }
  0x21   : > { %688 = vmatpush1.msk.msra.mxu0 %vm355_vm0, %v345_v5  ;;  %686 = vmatmul.mubr.msk.f32.vlgmr.msra.gmra.mrb[0].mxu1 %vm351_vm1, %v348_v8  ;;  %p771_p12 = scmp.ne.s32.totalorder %s984_s23, %s770_s11  ;;  %p778_p2 = scmp.lt.s32.totalorder %s776_s16, %s770_s11 }
  0x22   : > { %689 = vmatmul.mubr.msk.f32.vlgmr.msra.gmra.mrb[0].mxu0 %vm351_vm1, %v347_v9 }
  0x23   : > { %p772_p13 = pnand %p771_p12, %p936_p4  ;;  %p779_p3 = por %p778_p2, %p777_p1 }
  0x25   : > { %p773_p0 = pneg %p772_p13 }
  0x27   : > { %p780_p5 = pnand %p779_p3, %p773_p0 }
  0x92   : > { %v515_v10 = vpop.permute.xlu0 %514 }
  0x96   : > { %v525_v20 = vpop.permute.xlu0 %524 }
  0xf4   : > { %v426_v11 = vpop.f32.mrb[0].mxu1 }
  0xf5   : > { %v506_v12 = vpop.f32.mrb[0].mxu0  ;;  %v428_v14 = vpop.f32.mrb[1].mxu1 }
  0xf6   : > { %v507_v13 = vadd.f32 %v506_v12, %v426_v11  ;;  %v508_v15 = vpop.f32.mrb[1].mxu0 }
  0xf7   : > { %v509_v16 = vadd.f32 %v508_v15, %v428_v14 }
  0xf8   : > { %v517_v17 = vadd.f32 %v515_v10, %v507_v13 }
  0xf9   : > { %v518_v18 = vadd.f32 %v515_v10, %v509_v16 }
  0xfa   : > { %v519_v19 = vmax.f32 %v517_v17, 0.0 }
  0xfb   : > { %v520_v21 = vmax.f32 %v518_v18, 0.0 }
  0xfc   : > { %v527_v22 = vmul.f32 %v525_v20, %v519_v19 }
  0xfd   : > { %v528_v23 = vmul.f32 %v525_v20, %v520_v21 }
  0xfe   : > { %v529_v24 = vrot.slane %v527_v22, 4 }
  0xff   : > { %v535_v25 = vrot.slane %v528_v23, 4 }
 0x100   : > { %v530_v26 = vadd.f32 %v529_v24, %v527_v22 }
 0x101   : > { %v536_v27 = vadd.f32 %v535_v25, %v528_v23 }
 0x102   : > { %v531_v28 = vrot.slane %v530_v26, 2 }
 0x103   : > { %v537_v29 = vrot.slane %v536_v27, 2 }
 0x104   : > { %v532_v30 = vadd.f32 %v531_v28, %v530_v26 }
 0x105   : > { %v538_v31 = vadd.f32 %v537_v29, %v536_v27 }
 0x106   : > { %v533_v32 = vrot.slane %v532_v30, 1 }
 0x107   : > { %v539_v34 = vrot.slane %v538_v31, 1 }
 0x108   : > { %v534_v35 = vadd.f32 %v533_v32, %v532_v30 }
 0x109   : > { %v540_v36 = vadd.f32 %v539_v34, %v538_v31 }
 0x10a   : > { %v543_v37 = vadd.f32 %v542_v33, %v534_v35 }
 0x10b   : > { %v544_v38 = vadd.f32 %v542_v33, %v540_v36 }
 0x10c   : > { %v690_v39 = vmul.f32 -1.442695, %v543_v37 }
 0x10d   : > { %v691_v40 = vmul.f32 -1.442695, %v544_v38 }
 0x10e   : > { %762 = vpow2.f32 %v690_v39 }
 0x10f   : > { %764 = vpow2.f32 %v691_v40 }
 0x118   : > { %v763_v41 = vpop.eup %762 }
 0x119   : > { %v765_v42 = vpop.eup %764  ;;  %v551_v43 = vadd.f32 1.0, %v763_v41 }
 0x11a   : > { %v552_v44 = vadd.f32 1.0, %v765_v42 }
 0x11b   : > { %766 = vrcp.f32 %v551_v43 }
 0x11c   : > { %768 = vrcp.f32 %v552_v44 }
 0x125   : > { %v767_v45 = vpop.eup %766 }
 0x126   : > { %v769_v46 = vpop.eup %768 }
 0x127   : > { %v559_v47 = vcombine.low %v767_v45, %v769_v46 }
 0x129   : > { %v561_v48 = vmul.f32 %v559_v47, %v965_v4 }
 0x12b   : > { %562 = vst [vmem:[%s323_s22] sm:$0xff] %v561_v48 }
 0x12c   : > { %783 = shalt.err (!%p780_p5)
}
 0x12d   : > { %s784_s17 = scalar_lea.hbm %s982_s6, 128  ;;  %s788_s20 = scalar_lea.hbm %s1036_s7, 256 }
 0x12e   : > { %p785_p6 = scmp.ne.s32.totalorder %s982_s6, %s784_s17  ;;  %p789_p10 = scmp.lt.u32.totalorder %s982_s6, %s1036_s7 }
 0x12f   : > { %p790_p11 = scmp.lt.u32.totalorder %s788_s20, %s784_s17  ;;  %p792_p13 = scmp.lt.u32.totalorder %s784_s17, %s982_s6 }
 0x130   : > { %p786_p7 = pnand %p785_p6, %p936_p4 }
 0x131   : > { %p791_p12 = por %p790_p11, %p789_p10 }
 0x132   : > { %p787_p9 = pneg %p786_p7 }
 0x133   : > { %p793_p0 = por %p792_p13, %p791_p12 }
 0x135   : > { %p794_p1 = pnand %p793_p0, %p787_p9 }
 0x137   : > { %797 = shalt.err (!%p794_p1)
}
 0x138   : > { %702 = dma.vmem_to_hbm [thread:$0]  (%p936_p4), %s984_s23, 128, %s982_s6, %s564_s9  }
 0x139 PF: > { %p708_p2 = scmp.ge.s32.totalorder %s848_s8, 2  ;;  %s592_s24 = sand.u32 1, %s828_s26  }
 0x13a   : > { %s593_s25 = scalar_lea.sflag [#allocation4], %s592_s24 }
 0x13b   : > { %p705_p3 = pnand %p708_p2, %p943_p8 }
 0x13d   : > { %823 = dma.done.wait (!%p705_p3), %s593_s25, 128  }
 0x13e   : > { %825 = vsyncadd (!%p705_p3), %s593_s25, 4294967168  ;;  %s21_s8 = sadd.s32 1, %s848_s8   ;;  %s1039_s26 = smov %s832_s27 }
 0x13f   : > { %p18_p5 = scmp.ge.s32.totalorder %s21_s8, 4   ;;  %s1040_s27 = smov %s836_s28 }
 0x140   : > { %s1041_s28 = smov %s949_s15  ;;  %s1042_s29 = smov %s844_s30 }
 0x141   : > { %s1043_s30 = smov %s1045_s10  ;;  %20 = sbr.rel (!%p18_p5) target bundleno = 6 (0x6), region = 86 }
 0x148   :  { %598 = vsyncpa [#allocation4], 1 }
 0x149   :  { %600 = vsyncpa [#allocation4 + $0x1], 1 }

</bundles_post_ra>
